<compile_context>
chip_gen: v7x
topology: tpu7x:2x2x1
jax: 0.10.0
libtpu: 0.0.40
codegen_flags: <defaults>
</compile_context>

<pallas_src>
import functools

import jax
import jax.numpy as jnp
from jax.experimental import pallas as pl
from jax.experimental.pallas import tpu as pltpu


def _round_up(x, m):
    return ((x + m - 1) // m) * m


# ---------------------------------------------------------------------------
# Fused MLP kernel: Linear -> leaky_relu -> ... -> Linear, all in VMEM/vregs
# ---------------------------------------------------------------------------
def _fused_mlp_kernel(x_ref, w0_ref, wrest_ref, b_ref, o_ref, *,
                      n_layers, negative_slope):
    # x_ref    : (tile_b, in_pad)            f32  (slim input, no 128-col pad)
    # w0_ref   : (in_pad, d_pad)             bf16 (layer-0 weight, pre-transposed)
    # wrest_ref: (n_layers-1, d_pad, d_pad)  bf16 (stacked layers 1..N-1)
    # b_ref    : (n_layers, 1, d_pad)        f32  (stacked, zero-padded biases)
    # o_ref    : (tile_b, d_pad)             lane-dense output tile
    h = x_ref[...]
    # Layer 0: slim K (= real input width), lane-dense N. MXU bf16 in, f32 acc.
    y = jnp.dot(h.astype(jnp.bfloat16), w0_ref[...],
                preferred_element_type=jnp.float32)
    y = y + b_ref[0]                                   # f32 bias add (VPU)
    for i in range(1, n_layers):                       # static unroll over depth
        # F.leaky_relu (default negative_slope=0.01) on the previous layer.
        y = jnp.where(y > 0, y, negative_slope * y)
        y = jnp.dot(y.astype(jnp.bfloat16), wrest_ref[i - 1],
                    preferred_element_type=jnp.float32)
        y = y + b_ref[i]
    o_ref[...] = y.astype(o_ref.dtype)                 # full-width 128-lane store


# ---------------------------------------------------------------------------
# Batch tiling:
#   * small batches (<= 1024 rows, 8-aligned): one grid step, no forced split
#   * large batches: 1024-row tiles (multiple of 256) -> near HBM roofline,
#     and each v7x TensorCore gets a full-size tile when grid >= 2
# ---------------------------------------------------------------------------
def _pad_batch_and_tile(B, *, single_tile_max=1024, big_tile=1024):
    B8 = _round_up(B, 8)
    if B8 <= single_tile_max:
        return B8, B8
    return _round_up(B8, big_tile), big_tile


# ---------------------------------------------------------------------------
# Parameter init (PyTorch nn.Linear convention) + one-time packing for kernel
# ---------------------------------------------------------------------------
def init_oddset_params(hidden_layers, key):
    """Deterministic init matching OddsetNet.__init__ shapes.

    Returns list of (W, b) with W in PyTorch convention [out, in], f32.
    """
    dims = list(hidden_layers) + [3]          # final Linear(hidden_layers[-1], 3)
    params = []
    for i in range(len(dims) - 1):
        in_d, out_d = dims[i], dims[i + 1]
        key, kw, kb = jax.random.split(key, 3)
        bound = 1.0 / jnp.sqrt(in_d)
        W = jax.random.uniform(kw, (out_d, in_d), jnp.float32, -bound, bound)
        b = jax.random.uniform(kb, (out_d,), jnp.float32, -bound, bound)
        params.append((W, b))
    return params


def pack_params_for_kernel(params):
    """One-time packing.

    Layer 0 weight -> (round8(in_dim), D_PAD) bf16 (slim K, lane-dense N).
    Layers 1..N-1  -> single stacked (N-1, D_PAD, D_PAD) bf16 array.
    Biases         -> single stacked (N, 1, D_PAD) f32 array (zero-padded lanes
                      stay exactly zero through leaky_relu and later layers).
    """
    n_layers = len(params)
    in_dim = params[0][0].shape[1]
    in_pad = _round_up(in_dim, 8)
    d_pad = _round_up(max(W.shape[0] for W, _ in params), 128)

    W0, _ = params[0]
    out0 = W0.shape[0]
    w0 = jnp.zeros((in_pad, d_pad), jnp.float32).at[:in_dim, :out0].set(W0.T)
    w0 = w0.astype(jnp.bfloat16)

    wrest = jnp.zeros((max(n_layers - 1, 1), d_pad, d_pad), jnp.float32)
    for i in range(1, n_layers):
        Wi, _ = params[i]
        out_i, in_i = Wi.shape
        wrest = wrest.at[i - 1, :in_i, :out_i].set(Wi.T)
    wrest = wrest.astype(jnp.bfloat16)

    b_pack = jnp.zeros((n_layers, 1, d_pad), jnp.float32)
    for i, (_, bi) in enumerate(params):
        b_pack = b_pack.at[i, 0, :bi.shape[0]].set(bi)

    return w0, wrest, b_pack


# ---------------------------------------------------------------------------
# Forward pass: single pallas_call for the whole network
# ---------------------------------------------------------------------------
def oddset_net_forward(x, w0, wrest, b_pack, *, out_dim=3,
                       negative_slope=0.01, out_dtype=jnp.float32):
    B, in_dim = x.shape
    in_pad, d_pad = w0.shape
    n_layers = b_pack.shape[0]

    B_pad, tile_b = _pad_batch_and_tile(B)
    pad_rows = B_pad - B
    pad_cols = in_pad - in_dim
    if pad_rows or pad_cols:                  # cheap row/col pad only; usually a no-op
        x = jnp.pad(x, ((0, pad_rows), (0, pad_cols)))

    kernel = functools.partial(_fused_mlp_kernel, n_layers=n_layers,
                               negative_slope=negative_slope)

    out_pad = pl.pallas_call(
        kernel,
        out_shape=jax.ShapeDtypeStruct((B_pad, d_pad), out_dtype),
        grid=(B_pad // tile_b,),
        in_specs=[
            pl.BlockSpec((tile_b, in_pad), lambda i: (i, 0)),    # slim x tile
            pl.BlockSpec((in_pad, d_pad), lambda i: (0, 0)),     # layer-0 W (resident)
            pl.BlockSpec(wrest.shape, lambda i: (0, 0, 0)),      # stacked Ws (resident)
            pl.BlockSpec(b_pack.shape, lambda i: (0, 0, 0)),     # stacked biases
        ],
        out_specs=pl.BlockSpec((tile_b, d_pad), lambda i: (i, 0)),
        compiler_params=pltpu.CompilerParams(
            dimension_semantics=("parallel",),   # v7x megacore shards the batch axis
        ),
    )(x, w0, wrest, b_pack)

    return out_pad[:B, :out_dim].astype(jnp.float32)


# ---------------------------------------------------------------------------
# Pure-JAX references for correctness checking
# ---------------------------------------------------------------------------
def oddset_net_reference(x, params, use_bf16=True):
    n = len(params)
    h = x
    for i, (W, b) in enumerate(params):
        if use_bf16:
            y = jnp.dot(h.astype(jnp.bfloat16), W.T.astype(jnp.bfloat16),
                        preferred_element_type=jnp.float32) + b
        else:
            y = h @ W.T + b
        if i < n - 1:
            y = jnp.where(y > 0, y, 0.01 * y)
        h = y
    return h


if __name__ == "__main__":
    key = jax.random.PRNGKey(0)
    key, kx = jax.random.split(key)

    # Small shapes implied by the forward: x is [batch, hidden_layers[0]].
    hidden_layers = [32, 64, 32]
    batch = 8
    x = jax.random.normal(kx, (batch, hidden_layers[0]), jnp.float32)

    params = init_oddset_params(hidden_layers, key)
    w0, wrest, b_pack = pack_params_for_kernel(params)      # one-time packing

    out = oddset_net_forward(x, w0, wrest, b_pack)
    out = jax.block_until_ready(out)

    ref_bf16 = oddset_net_reference(x, params, use_bf16=True)   # matches kernel math
    ref_f32 = oddset_net_reference(x, params, use_bf16=False)   # module-exact f32

    assert out.shape == (batch, 3), out.shape
    assert jnp.allclose(out, ref_bf16, atol=1e-3, rtol=1e-3), "mismatch vs bf16 reference"
    assert jnp.allclose(out, ref_f32, atol=5e-2, rtol=5e-2), "mismatch vs f32 reference"

    print("KERNEL_OK")
</pallas_src>

<mosaic_0001>
module attributes {stable_mosaic.version = 11 : i64} {
  func.func @_fused_mlp_kernel(%arg0: i32, %arg1: memref<8x32xf32, #tpu.memory_space<vmem>>, %arg2: memref<32x128xbf16, #tpu.memory_space<vmem>>, %arg3: memref<2x128x128xbf16, #tpu.memory_space<vmem>>, %arg4: memref<3x1x128xf32, #tpu.memory_space<vmem>>, %arg5: memref<8x128xf32, #tpu.memory_space<vmem>>) attributes {dimension_semantics = [#tpu.dimension_semantics<parallel>], iteration_bounds = array<i64: 1>, scalar_prefetch = 0 : i64, scratch_operands = 0 : i64, tpu.core_type = #tpu.core_type<tc>, window_params = [{transform_indices = @transform_0, window_bounds = array<i64: 8, 32>}, {pipeline_mode = #tpu.pipeline_mode<synchronous>, transform_indices = @transform_1, window_bounds = array<i64: 32, 128>}, {pipeline_mode = #tpu.pipeline_mode<synchronous>, transform_indices = @transform_2, window_bounds = array<i64: 2, 128, 128>}, {pipeline_mode = #tpu.pipeline_mode<synchronous>, transform_indices = @transform_3, window_bounds = array<i64: 3, 1, 128>}, {transform_indices = @transform_4, window_bounds = array<i64: 8, 128>}]} {
    %c0 = arith.constant 0 : index
    %c0_0 = arith.constant 0 : index
    %0 = vector.load %arg1[%c0, %c0_0] : memref<8x32xf32, #tpu.memory_space<vmem>>, vector<8x32xf32>
    %1 = arith.truncf %0 : vector<8x32xf32> to vector<8x32xbf16>
    %c0_1 = arith.constant 0 : index
    %c0_2 = arith.constant 0 : index
    %2 = vector.load %arg2[%c0_1, %c0_2] : memref<32x128xbf16, #tpu.memory_space<vmem>>, vector<32x128xbf16>
    %cst = arith.constant dense<0.000000e+00> : vector<8x128xf32>
    %3 = tpu.matmul %1, %2, %cst {dimension_numbers = #tpu.dot_dimension_numbers<[1], [0], [0], [1], [0, 0, 1, 1], [], []>} : vector<8x32xbf16>, vector<32x128xbf16>, vector<8x128xf32> -> vector<8x128xf32>
    %c0_3 = arith.constant 0 : index
    %c0_4 = arith.constant 0 : index
    %c0_5 = arith.constant 0 : index
    %4 = vector.load %arg4[%c0_3, %c0_4, %c0_5] : memref<3x1x128xf32, #tpu.memory_space<vmem>>, vector<1x1x128xf32>
    %5 = vector.shape_cast %4 : vector<1x1x128xf32> to vector<1x128xf32>
    %6 = vector.broadcast %5 : vector<1x128xf32> to vector<8x128xf32>
    %7 = arith.addf %3, %6 : vector<8x128xf32>
    %cst_6 = arith.constant 0.000000e+00 : f32
    %8 = vector.broadcast %cst_6 : f32 to vector<8x128xf32>
    %9 = arith.cmpf ogt, %7, %8 : vector<8x128xf32>
    %cst_7 = arith.constant 0.00999999977 : f32
    %10 = vector.broadcast %cst_7 : f32 to vector<8x128xf32>
    %11 = arith.mulf %10, %7 : vector<8x128xf32>
    %12 = arith.select %9, %7, %11 : vector<8x128xi1>, vector<8x128xf32>
    %13 = arith.truncf %12 : vector<8x128xf32> to vector<8x128xbf16>
    %c0_8 = arith.constant 0 : index
    %c0_9 = arith.constant 0 : index
    %c0_10 = arith.constant 0 : index
    %14 = vector.load %arg3[%c0_8, %c0_9, %c0_10] : memref<2x128x128xbf16, #tpu.memory_space<vmem>>, vector<1x128x128xbf16>
    %15 = vector.shape_cast %14 : vector<1x128x128xbf16> to vector<128x128xbf16>
    %cst_11 = arith.constant dense<0.000000e+00> : vector<8x128xf32>
    %16 = tpu.matmul %13, %15, %cst_11 {dimension_numbers = #tpu.dot_dimension_numbers<[1], [0], [0], [1], [0, 0, 1, 1], [], []>} : vector<8x128xbf16>, vector<128x128xbf16>, vector<8x128xf32> -> vector<8x128xf32>
    %c1 = arith.constant 1 : index
    %c0_12 = arith.constant 0 : index
    %c0_13 = arith.constant 0 : index
    %17 = vector.load %arg4[%c1, %c0_12, %c0_13] : memref<3x1x128xf32, #tpu.memory_space<vmem>>, vector<1x1x128xf32>
    %18 = vector.shape_cast %17 : vector<1x1x128xf32> to vector<1x128xf32>
    %19 = vector.broadcast %18 : vector<1x128xf32> to vector<8x128xf32>
    %20 = arith.addf %16, %19 : vector<8x128xf32>
    %cst_14 = arith.constant 0.000000e+00 : f32
    %21 = vector.broadcast %cst_14 : f32 to vector<8x128xf32>
    %22 = arith.cmpf ogt, %20, %21 : vector<8x128xf32>
    %cst_15 = arith.constant 0.00999999977 : f32
    %23 = vector.broadcast %cst_15 : f32 to vector<8x128xf32>
    %24 = arith.mulf %23, %20 : vector<8x128xf32>
    %25 = arith.select %22, %20, %24 : vector<8x128xi1>, vector<8x128xf32>
    %26 = arith.truncf %25 : vector<8x128xf32> to vector<8x128xbf16>
    %c1_16 = arith.constant 1 : index
    %c0_17 = arith.constant 0 : index
    %c0_18 = arith.constant 0 : index
    %27 = vector.load %arg3[%c1_16, %c0_17, %c0_18] : memref<2x128x128xbf16, #tpu.memory_space<vmem>>, vector<1x128x128xbf16>
    %28 = vector.shape_cast %27 : vector<1x128x128xbf16> to vector<128x128xbf16>
    %cst_19 = arith.constant dense<0.000000e+00> : vector<8x128xf32>
    %29 = tpu.matmul %26, %28, %cst_19 {dimension_numbers = #tpu.dot_dimension_numbers<[1], [0], [0], [1], [0, 0, 1, 1], [], []>} : vector<8x128xbf16>, vector<128x128xbf16>, vector<8x128xf32> -> vector<8x128xf32>
    %c2 = arith.constant 2 : index
    %c0_20 = arith.constant 0 : index
    %c0_21 = arith.constant 0 : index
    %30 = vector.load %arg4[%c2, %c0_20, %c0_21] : memref<3x1x128xf32, #tpu.memory_space<vmem>>, vector<1x1x128xf32>
    %31 = vector.shape_cast %30 : vector<1x1x128xf32> to vector<1x128xf32>
    %32 = vector.broadcast %31 : vector<1x128xf32> to vector<8x128xf32>
    %33 = arith.addf %29, %32 : vector<8x128xf32>
    %c0_22 = arith.constant 0 : index
    %c0_23 = arith.constant 0 : index
    %34 = vector.load %arg5[%c0_22, %c0_23] : memref<8x128xf32, #tpu.memory_space<vmem>>, vector<8x128xf32>
    tpu.vector_store %arg5[%c0_22, %c0_23], %33 {strides = array<i32>} : memref<8x128xf32, #tpu.memory_space<vmem>>, vector<8x128xf32>,
    return
  }
  func.func @transform_0(%arg0: i32) -> (i32, i32) {
    %c0_i32 = arith.constant 0 : i32
    %c0_i32_0 = arith.constant 0 : i32
    return %arg0, %c0_i32 : i32, i32
  }
  func.func @transform_1(%arg0: i32) -> (i32, i32) {
    %c0_i32 = arith.constant 0 : i32
    %c0_i32_0 = arith.constant 0 : i32
    %c0_i32_1 = arith.constant 0 : i32
    return %c0_i32, %c0_i32_0 : i32, i32
  }
  func.func @transform_2(%arg0: i32) -> (i32, i32, i32) {
    %c0_i32 = arith.constant 0 : i32
    %c0_i32_0 = arith.constant 0 : i32
    %c0_i32_1 = arith.constant 0 : i32
    %c0_i32_2 = arith.constant 0 : i32
    return %c0_i32, %c0_i32_0, %c0_i32_1 : i32, i32, i32
  }
  func.func @transform_3(%arg0: i32) -> (i32, i32, i32) {
    %c0_i32 = arith.constant 0 : i32
    %c0_i32_0 = arith.constant 0 : i32
    %c0_i32_1 = arith.constant 0 : i32
    %c0_i32_2 = arith.constant 0 : i32
    return %c0_i32, %c0_i32_0, %c0_i32_1 : i32, i32, i32
  }
  func.func @transform_4(%arg0: i32) -> (i32, i32) {
    %c0_i32 = arith.constant 0 : i32
    %c0_i32_0 = arith.constant 0 : i32
    return %arg0, %c0_i32 : i32, i32
  }
}

</mosaic_0001>

<bundles_post_ra>
// kernel: tpu_custom_call.1
= control target key start
LH: loop header
LB: loop body
LE: loop exit
PB: predicated region body
PF: predicated region fallthrough
CT: control target
= control target key end

     0   :  { %9 = vsyncpa [#allocation3], 0  ;;  %s710_s0 = inlined_call_operand.hbm [shape: f32[8,32], index: 0, kind: input, shape index: {}]   ;;  %s711_s1 = inlined_call_operand.hbm [shape: bf16[32,128], index: 1, kind: input, shape index: {}]   ;;  %s712_s2 = inlined_call_operand.hbm [shape: bf16[2,128,128], index: 2, kind: input, shape index: {}]   ;;  %s713_s3 = inlined_call_operand.vmem [shape: f32[3,1,128], index: 3, kind: input, shape index: {}]   ;;  %s714_s4 = inlined_call_operand.hbm [shape: f32[8,128], index: 4, kind: output, shape index: {}]  }
   0x1   :  { %10 = vsyncpa [#allocation6], 0 }
   0x2   :  { %11 = vsyncpa [#allocation4], 0  ;;  %s590_s15 = smov [#allocation5]   ;;  %s496_s19 = scalar_lea.hbm %s711_s1, 256 }
   0x3   :  { %s27_s16 = sshll.u32 %s590_s15, 4  ;;  %p497_p0 = scmp.ne.s32.totalorder %s711_s1, %s496_s19  ;;  %s28_s16 = int_to_ptr.vmem [resolvable:$true] %s27_s16 }
   0x4   :  { %p500_p1 = scmp.lt.u32.totalorder %s496_s19, %s711_s1 }
   0x6   :  { %p502_p2 = pnand %p500_p1, %p497_p0 }
   0x8   :  { %505 = shalt.err (!%p502_p2)
}
   0x9   :  { %s506_s24 = scalar_lea.vmem %s28_s16, 256  ;;  %p511_p4 = scmp.lt.s32.totalorder %s28_s16, %s28_s16 }
   0xa   :  { %p507_p3 = scmp.ne.s32.totalorder %s28_s16, %s506_s24  ;;  %p512_p5 = scmp.lt.s32.totalorder %s506_s24, %s506_s24 }
   0xc   :  { %p513_p6 = por %p512_p5, %p511_p4 }
   0xe   :  { %p514_p7 = pnand %p513_p6, %p507_p3 }
  0x10   :  { %517 = shalt.err (!%p514_p7)
}
  0x11   :  { %s591_s25 = smov 64   ;;  %s592_s26 = smov 4  }
  0x12   :  { %33 = dma.hbm_to_vmem [thread:$0]  %s711_s1, 256, %s28_s16, [#allocation6], %s591_s25, %s591_s25, %s592_s26  }
  0x13   :  { %s593_s29 = smov [#allocation2]   ;;  %s594_s5 = smov [#allocation7]  }
  0x14   :  { %s18_s30 = sshll.u32 %s593_s29, 4  ;;  %s39_s6 = sshll.u32 %s594_s5, 4  ;;  %s19_s30 = int_to_ptr.vmem [resolvable:$true] %s18_s30  ;;  %s40_s6 = int_to_ptr.vmem [resolvable:$true] %s39_s6 }
  0x15   :  { %s518_s9 = scalar_lea.hbm %s710_s0, 128 }
  0x16   :  { %p519_p8 = scmp.ne.s32.totalorder %s710_s0, %s518_s9  ;;  %p522_p9 = scmp.lt.u32.totalorder %s518_s9, %s710_s0 }
  0x18   :  { %p524_p10 = pnand %p522_p9, %p519_p8 }
  0x1a   :  { %527 = shalt.err (!%p524_p10)
}
  0x1b   :  { %s528_s1 = scalar_lea.vmem %s19_s30, 128  ;;  %p533_p12 = scmp.lt.s32.totalorder %s19_s30, %s19_s30 }
  0x1c   :  { %p529_p11 = scmp.ne.s32.totalorder %s19_s30, %s528_s1  ;;  %p534_p13 = scmp.lt.s32.totalorder %s528_s1, %s528_s1 }
  0x1e   :  { %p535_p0 = por %p534_p13, %p533_p12 }
  0x20   :  { %p536_p1 = pnand %p535_p0, %p529_p11 }
  0x22   :  { %539 = shalt.err (!%p536_p1)
}
  0x23   :  { %21 = dma.hbm_to_vmem [thread:$0]  %s710_s0, 128, %s19_s30, [#allocation3]  }
  0x24   :  { %s540_s18 = scalar_lea.hbm %s712_s2, 2048 }
  0x25   :  { %p541_p2 = scmp.ne.s32.totalorder %s712_s2, %s540_s18  ;;  %p544_p3 = scmp.lt.u32.totalorder %s540_s18, %s712_s2 }
  0x27   :  { %p546_p4 = pnand %p544_p3, %p541_p2 }
  0x29   :  { %549 = shalt.err (!%p546_p4)
}
  0x2a   :  { %s550_s23 = scalar_lea.vmem %s40_s6, 2048  ;;  %p555_p6 = scmp.lt.s32.totalorder %s40_s6, %s40_s6 }
  0x2b   :  { %p551_p5 = scmp.ne.s32.totalorder %s40_s6, %s550_s23  ;;  %p556_p7 = scmp.lt.s32.totalorder %s550_s23, %s550_s23 }
  0x2d   :  { %p557_p8 = por %p556_p7, %p555_p6 }
  0x2f   :  { %p558_p9 = pnand %p557_p8, %p551_p5 }
  0x31   :  { %561 = shalt.err (!%p558_p9)
}
  0x32   :  { %45 = dma.hbm_to_vmem [thread:$0]  %s712_s2, 2048, %s40_s6, [#allocation6], %s591_s25, %s591_s25, %s592_s26  }
  0x33   :  { %584 = dma.done.wait [#allocation3], 128  }
  0x34   :  { %585 = vsyncadd [#allocation3], 4294967168 }
  0x35   :  { %586 = dma.done.wait [#allocation6], 2304  }
  0x36   :  { %587 = vsyncadd [#allocation6], 4294964992  ;;  %v595_v0 = vmov 0.0   ;;  %vm596_vm0 = vmmov 0   ;;  %v478_v1 = vld [vmem:[#allocation5] sm:$0xff]   ;;  %v479_v2 = vld [vmem:[#allocation5 + $0x8] sm:$0xff]  }
  0x37   :  { %422 = vmatprep.subr.bf16.mxu0 %v595_v0  ;;  %426 = vmatprep.mubr.msk.bf16.mxu0 %vm596_vm0, %v595_v0  ;;  %v58_v3 = vld [vmem:[#allocation2] sm:$0xff]  ;;  %v480_v4 = vld [vmem:[#allocation7] sm:$0xff]   ;;  %vm83_vm1 = vcmask 261120   ;;  %v482_v7 = vld [vmem:[#allocation7 + $0x10] sm:$0xff]   ;;  %s597_s30 = smov [#allocation8]  }
  0x38   :  { %430 = vmatprep.subr.bf16.mxu1 %v595_v0  ;;  %446 = vmatprep.mubr.msk.bf16.mxu1 %vm596_vm0, %v595_v0  ;;  %v59_v5 = vpack.c.bf16 %v58_v3, %v58_v3  ;;  %v481_v6 = vld [vmem:[#allocation7 + $0x8] sm:$0xff]   ;;  %v483_v8 = vld [vmem:[#allocation7 + $0x18] sm:$0xff]   ;;  %v484_v9 = vld [vmem:[#allocation7 + $0x20] sm:$0xff]   ;;  %s367_s5 = sshll.u32 %s597_s30, 4  ;;  %s368_s5 = int_to_ptr.vmem [resolvable:$true] %s367_s5 }
  0x39   :  { %423 = vmatpush3.bf16.msra.mxu0 %v478_v1  ;;  %431 = vmatpush3.bf16.msra.mxu1 %v480_v4  ;;  %v485_v10 = vld [vmem:[#allocation7 + $0x28] sm:$0xff]   ;;  %v486_v11 = vld [vmem:[#allocation7 + $0x30] sm:$0xff]   ;;  %v487_v12 = vld [vmem:[#allocation7 + $0x38] sm:$0xff]   ;;  %s562_s6 = scalar_lea.vmem %s368_s5, 128  ;;  %p567_p11 = scmp.lt.s32.totalorder %s368_s5, %s368_s5 }
  0x3a   :  { %424 = vmatprep.subr.bf16.mxu0 %v595_v0  ;;  %432 = vmatprep.subr.bf16.mxu1 %v595_v0  ;;  %v488_v13 = vld [vmem:[#allocation7 + $0x40] sm:$0xff]   ;;  %v489_v14 = vld [vmem:[#allocation7 + $0x48] sm:$0xff]   ;;  %v490_v15 = vld [vmem:[#allocation7 + $0x50] sm:$0xff]   ;;  %p563_p10 = scmp.ne.s32.totalorder %s368_s5, %s562_s6  ;;  %p568_p12 = scmp.lt.s32.totalorder %s562_s6, %s562_s6 }
  0x3b   :  { %v491_v16 = vld [vmem:[#allocation7 + $0x58] sm:$0xff]   ;;  %v492_v17 = vld [vmem:[#allocation7 + $0x60] sm:$0xff]   ;;  %v493_v18 = vld [vmem:[#allocation7 + $0x68] sm:$0xff]  }
  0x3c   :  { %v377_v19 = vld [vmem:[%s713_s3] ss:$0 sm:$0xff]  ;;  %v494_v28 = vld [vmem:[#allocation7 + $0x70] sm:$0xff]   ;;  %v495_v29 = vld [vmem:[#allocation7 + $0x78] sm:$0xff]   ;;  %p569_p13 = por %p568_p12, %p567_p11 }
  0x3d   :  { %425 = vmatpush3.bf16.msra.mxu0 %v479_v2  ;;  %433 = vmatpush3.bf16.msra.mxu1 %v481_v6  ;;  %v382_v30 = vld [vmem:[%s713_s3 + $0x1] ss:$0 sm:$0xff]  ;;  %v392_v39 = vld [vmem:[%s713_s3 + $0x2] ss:$0 sm:$0xff] }
  0x3e   :  { %450 = vmatprep.subr.bf16.mxu0 %v595_v0  ;;  %434 = vmatprep.subr.bf16.mxu1 %v595_v0  ;;  %p570_p0 = pnand %p569_p13, %p563_p10 }
  0x40   :  { %427 = vmatmul.mubr.msk.bf16.vlgmr.msra.gmra.mrb[0].mxu0 %vm83_vm1, %v59_v5 }
  0x41   :  { %466 = vmatprep.mubr.msk.bf16.mxu0 %vm596_vm0, %v595_v0  ;;  %435 = vmatpush3.bf16.msra.mxu1 %v482_v7 }
  0x42   :  { %436 = vmatprep.subr.bf16.mxu1 %v595_v0  ;;  %451 = vmatpush3.bf16.msra.mxu0 %v488_v13 }
  0x43   :  { %452 = vmatprep.subr.bf16.mxu0 %v595_v0 }
  0x45   :  { %437 = vmatpush3.bf16.msra.mxu1 %v483_v8 }
  0x46   :  { %438 = vmatprep.subr.bf16.mxu1 %v595_v0  ;;  %453 = vmatpush3.bf16.msra.mxu0 %v489_v14 }
  0x47   :  { %454 = vmatprep.subr.bf16.mxu0 %v595_v0 }
  0x49   :  { %439 = vmatpush3.bf16.msra.mxu1 %v484_v9 }
  0x4a   :  { %440 = vmatprep.subr.bf16.mxu1 %v595_v0  ;;  %455 = vmatpush3.bf16.msra.mxu0 %v490_v15 }
  0x4b   :  { %456 = vmatprep.subr.bf16.mxu0 %v595_v0 }
  0x4d   :  { %441 = vmatpush3.bf16.msra.mxu1 %v485_v10 }
  0x4e   :  { %442 = vmatprep.subr.bf16.mxu1 %v595_v0  ;;  %457 = vmatpush3.bf16.msra.mxu0 %v491_v16 }
  0x4f   :  { %458 = vmatprep.subr.bf16.mxu0 %v595_v0 }
  0x51   :  { %443 = vmatpush3.bf16.msra.mxu1 %v486_v11 }
  0x52   :  { %444 = vmatprep.subr.bf16.mxu1 %v595_v0  ;;  %459 = vmatpush3.bf16.msra.mxu0 %v492_v17 }
  0x53   :  { %460 = vmatprep.subr.bf16.mxu0 %v595_v0 }
  0x55   :  { %445 = vmatpush3.bf16.msra.mxu1 %v487_v12 }
  0x56   :  { %461 = vmatpush3.bf16.msra.mxu0 %v493_v18 }
  0x57   :  { %462 = vmatprep.subr.bf16.mxu0 %v595_v0 }
  0x5a   :  { %463 = vmatpush3.bf16.msra.mxu0 %v494_v28 }
  0x5b   :  { %464 = vmatprep.subr.bf16.mxu0 %v595_v0 }
  0x5e   :  { %465 = vmatpush3.bf16.msra.mxu0 %v495_v29 }
 0x113   :  { %v121_v20 = vpop.f32.mrb[0].mxu0 }
 0x114   :  { %v122_v21 = vadd.f32 %v377_v19, %v121_v20  ;;  %v428_v22 = vpop.f32.mrb[1].mxu0 }
 0x115   :  { %v124_v23 = vpop.f32.mrb[2].mxu0 }
 0x116   :  { %vm127_vm2 = vcmp.gt.f32.partialorder %v122_v21, 0.0  ;;  %v128_v24 = vmul.f32 0.01, %v122_v21  ;;  %v429_v25 = vpop.f32.mrb[3].mxu0 }
 0x118   :  { %v129_v26 = vsel %vm127_vm2, %v122_v21, %v128_v24 }
 0x119   :  { %v130_v27 = vpack.c.bf16 %v129_v26, %v129_v26 }
 0x11b   :  { %447 = vmatmul.mubr.bf16.vlgmr.msra.gmra.mrb[0].mxu1 %v130_v27 }
 0x1ee   :  { %v237_v31 = vpop.f32.mrb[0].mxu1 }
 0x1ef   :  { %v238_v32 = vadd.f32 %v382_v30, %v237_v31  ;;  %v448_v33 = vpop.f32.mrb[1].mxu1 }
 0x1f0   :  { %v240_v34 = vpop.f32.mrb[2].mxu1 }
 0x1f1   :  { %vm243_vm3 = vcmp.gt.f32.partialorder %v238_v32, 0.0  ;;  %v244_v35 = vmul.f32 0.01, %v238_v32  ;;  %v449_v36 = vpop.f32.mrb[3].mxu1 }
 0x1f3   :  { %v245_v37 = vsel %vm243_vm3, %v238_v32, %v244_v35 }
 0x1f4   :  { %v246_v38 = vpack.c.bf16 %v245_v37, %v245_v37 }
 0x1f6   :  { %467 = vmatmul.mubr.bf16.vlgmr.msra.gmra.mrb[4].mxu0 %v246_v38 }
 0x2c9   :  { %v354_v40 = vpop.f32.mrb[4].mxu0 }
 0x2ca   :  { %v355_v41 = vadd.f32 %v392_v39, %v354_v40  ;;  %v468_v42 = vpop.f32.mrb[5].mxu0 }
 0x2cb   :  { %v357_v43 = vpop.f32.mrb[6].mxu0 }
 0x2cc   :  { %360 = vst [vmem:[#allocation8] sm:$0xff] %v355_v41  ;;  %v469_v44 = vpop.f32.mrb[7].mxu0 }
 0x2cd   :  { %573 = shalt.err (!%p570_p0)
}
 0x2ce   :  { %s574_s3 = scalar_lea.hbm %s714_s4, 128 }
 0x2cf   :  { %p575_p1 = scmp.ne.s32.totalorder %s714_s4, %s574_s3  ;;  %p578_p2 = scmp.lt.u32.totalorder %s574_s3, %s714_s4 }
 0x2d1   :  { %p580_p3 = pnand %p578_p2, %p575_p1 }
 0x2d3   :  { %583 = shalt.err (!%p580_p3)
}
 0x2d4   :  { %370 = dma.vmem_to_hbm [thread:$0]  %s368_s5, 128, %s714_s4, [#allocation4]  }
 0x2d5   :  { %588 = dma.done.wait [#allocation4], 128  }
 0x2d6   :  { %589 = vsyncadd [#allocation4], 4294967168 }
 0x2d7   :  { %374 = vsyncpa [#allocation3], 1 }
 0x2d8   :  { %375 = vsyncpa [#allocation6], 1 }
 0x2d9   :  { %376 = vsyncpa [#allocation4], 1 }

</bundles_post_ra>
